<compile_context>
chip_gen: v7x
topology: tpu7x:2x2x1
jax: 0.10.0
libtpu: 0.0.40
codegen_flags: <defaults>
</compile_context>

<pallas_src>
import functools

import jax
import jax.numpy as jnp
from jax.experimental import pallas as pl
from jax.experimental.pallas import tpu as pltpu

KEY_OUTPUT = "metric_depth"

_LANES = 128
_BETA = 1.0  # nn.SmoothL1Loss default


def extract_key(prediction, key):
    if isinstance(prediction, dict):
        return prediction[key]
    return prediction


def _smooth_l1(diff):
    ad = jnp.abs(diff)
    return jnp.where(ad < _BETA, (0.5 / _BETA) * diff * diff, ad - 0.5 * _BETA)


# ------------------------- per-chip static tuning --------------------------- #

def _query_tpu():
    """Best-effort TensorCore count + VMEM capacity, with safe defaults."""
    cores, vmem = 1, 64 * 1024 * 1024          # conservative (v7x-sized) default
    try:
        info = pltpu.get_tpu_info()
        vmem = int(getattr(info, "vmem_capacity_bytes", vmem))
        for attr in ("num_tensorcores", "tensorcore_count", "num_cores", "core_count"):
            v = getattr(info, attr, None)
            if isinstance(v, int) and v > 0:
                cores = v
                break
    except Exception:
        pass
    return max(1, min(cores, 2)), vmem


_NUM_CORES, _VMEM_BYTES = _query_tpu()
# v5e/v6e (128 MiB physical) -> 64 MiB scoped limit; v7x (64 MiB) -> 32 MiB.
_VMEM_LIMIT_BYTES = int(max(32 * 1024 * 1024, min(_VMEM_BYTES // 2, 64 * 1024 * 1024)))


def _round_up(x, m):
    return ((x + m - 1) // m) * m


# ------------------------------ Pallas kernels ------------------------------ #

def _make_kernels(H, bh, HBs, needs_tail):
    """Kernels closed over static tiling constants.

    Grid = (split, n, c, h_block); outputs are per-split scalar accumulators.
    """

    def _row_ok(shape):
        # Valid-row mask for the current H block: handles the ragged H tail and
        # the duplicated (clamped) steps of an uneven split.
        hb = pl.program_id(0) * HBs + pl.program_id(3)
        nrows = H - hb * bh                        # <= 0 for duplicated steps
        rows = jax.lax.broadcasted_iota(jnp.int32, shape, 0)
        return rows < nrows

    def sum_kernel(pred_ref, targ_ref, sum_ref):
        first = ((pl.program_id(1) == 0) & (pl.program_id(2) == 0)
                 & (pl.program_id(3) == 0))

        @pl.when(first)
        def _():
            sum_ref[...] = jnp.zeros_like(sum_ref)

        diff = pred_ref[...].astype(jnp.float32) - targ_ref[...].astype(jnp.float32)
        elem = _smooth_l1(diff)
        if needs_tail:
            elem = jnp.where(_row_ok(elem.shape), elem, 0.0)
        sum_ref[...] += jnp.sum(elem)

    def masked_sum_kernel(pred_ref, targ_ref, mask_ref, sum_ref, cnt_ref):
        first = ((pl.program_id(1) == 0) & (pl.program_id(2) == 0)
                 & (pl.program_id(3) == 0))

        @pl.when(first)
        def _():
            sum_ref[...] = jnp.zeros_like(sum_ref)
            cnt_ref[...] = jnp.zeros_like(cnt_ref)

        diff = pred_ref[...].astype(jnp.float32) - targ_ref[...].astype(jnp.float32)
        elem = _smooth_l1(diff)
        m = mask_ref[...].astype(jnp.float32)      # int8 -> f32 in-kernel
        if needs_tail:
            ok = _row_ok(elem.shape)
            elem = jnp.where(ok, elem, 0.0)        # select (not multiply): OOB rows may be garbage
            m = jnp.where(ok, m, 0.0)
        sum_ref[...] += jnp.sum(elem * m)
        cnt_ref[...] += jnp.sum(m)

    return sum_kernel, masked_sum_kernel


def _pred_index_map(HB, HBs):
    def idx(s, n, c, h):
        return (n, c, jnp.minimum(s * HBs + h, HB - 1), 0)
    return idx


def _bcast_index_map(leading_shape, HB, HBs):
    """index_map for target/mask: broadcasts over batch/channel by ignoring the
    corresponding grid index when that array dim is 1 (no HBM materialization)."""
    dN, dC = leading_shape

    def idx(s, n, c, h):
        return (n if dN > 1 else 0,
                c if dC > 1 else 0,
                jnp.minimum(s * HBs + h, HB - 1), 0)
    return idx


# -------------------------------- JAX wrapper -------------------------------- #

def _interpolate_bilinear_align_corners(x, out_hw):
    """NCHW bilinear resize, align_corners=True.
    # TODO(synk): kept as plain-JAX glue (gather-heavy resize; not worth a
    # dedicated Pallas kernel for a scalar loss)."""
    n, c, h, w = x.shape
    oh, ow = out_hw
    if (h, w) == (oh, ow):
        return x

    def coords(out_size, in_size):
        if out_size == 1:
            return jnp.zeros((out_size,), jnp.float32)
        scale = (in_size - 1) / (out_size - 1)
        return jnp.arange(out_size, dtype=jnp.float32) * scale

    ys = coords(oh, h)
    xs = coords(ow, w)
    y0 = jnp.clip(jnp.floor(ys).astype(jnp.int32), 0, h - 1)
    y1 = jnp.clip(y0 + 1, 0, h - 1)
    x0 = jnp.clip(jnp.floor(xs).astype(jnp.int32), 0, w - 1)
    x1 = jnp.clip(x0 + 1, 0, w - 1)
    wy = (ys - y0.astype(jnp.float32))[None, None, :, None]
    wx = (xs - x0.astype(jnp.float32))[None, None, None, :]

    xf = x.astype(jnp.float32)
    g = lambda yi, xi: xf[:, :, yi, :][:, :, :, xi]
    top = g(y0, x0) * (1 - wx) + g(y0, x1) * wx
    bot = g(y1, x0) * (1 - wx) + g(y1, x1) * wx
    return top * (1 - wy) + bot * wy


@functools.partial(jax.jit, static_argnames=("interpolate", "block_h", "num_splits"))
def _l1_smooth_loss_impl(pred, target, mask=None, *, interpolate=True,
                         block_h=None, num_splits=None):
    if pred.ndim == 3:
        pred = pred[:, None]
    if target.ndim == 3:
        target = target[:, None]
    if pred.shape[-1] != target.shape[-1] and interpolate:
        pred = _interpolate_bilinear_align_corners(pred, target.shape[-2:])

    N, C, H, W = pred.shape
    n_elem = N * C * H * W
    masked = mask is not None

    # ---- block-height / split selection from queried chip info -------------
    w_pad = _round_up(W, _LANES)                     # VMEM lane padding
    bytes_per_row = w_pad * (2 * 2 * 4 + (2 * 1 if masked else 0))  # dbl-buffered f32 (+int8 mask)
    budget = max(1 << 20, _VMEM_LIMIT_BYTES // 2)    # headroom for outputs/internal scratch
    bh = budget // bytes_per_row
    if block_h is not None:
        bh = block_h
    # Sublane granularity: 8 for f32; 32 keeps int8 mask tiles legal too.
    sub = 32 if masked else 8
    if bh >= H:
        bh = H                                       # full-dim block (always legal)
    else:
        bh = max(sub, (bh // sub) * sub)
        if bh >= H:
            bh = H
    HB = pl.cdiv(H, bh)

    S = num_splits if num_splits is not None else _NUM_CORES
    S = max(1, min(S, HB))                           # no point splitting past HB
    HBs = pl.cdiv(HB, S)
    needs_tail = (H % bh != 0) or (S * HBs != HB)

    grid = (S, N, C, HBs)
    sum_kernel, masked_sum_kernel = _make_kernels(H, bh, HBs, needs_tail)

    pred_spec = pl.BlockSpec((None, None, bh, W), _pred_index_map(HB, HBs))
    targ_spec = pl.BlockSpec((None, None, bh, W),
                             _bcast_index_map(target.shape[:2], HB, HBs))
    out_spec = pl.BlockSpec((1, 1, 1), lambda s, n, c, h: (s, 0, 0))
    acc_shape = jax.ShapeDtypeStruct((S, 1, 1), jnp.float32)
    cparams = pltpu.CompilerParams(
        dimension_semantics=("parallel", "arbitrary", "arbitrary", "arbitrary"),
        vmem_limit_bytes=_VMEM_LIMIT_BYTES)

    if not masked:
        cost = pl.CostEstimate(
            flops=8 * n_elem,
            transcendentals=0,
            bytes_accessed=int(n_elem * (pred.dtype.itemsize + target.dtype.itemsize)))
        sums = pl.pallas_call(
            sum_kernel,
            out_shape=acc_shape,
            grid_spec=pltpu.PrefetchScalarGridSpec(
                num_scalar_prefetch=0, grid=grid,
                in_specs=[pred_spec, targ_spec], out_specs=out_spec),
            compiler_params=cparams,
            cost_estimate=cost,
        )(pred, target)
        return jnp.sum(sums) / jnp.float32(n_elem)

    if mask.ndim == 3:
        mask = mask[:, None]
    mask_i8 = mask.astype(jnp.int8)     # bool -> int8: tiny pass, 1 B/elem streamed
    mask_spec = pl.BlockSpec((None, None, bh, W),
                             _bcast_index_map(mask_i8.shape[:2], HB, HBs))
    cost = pl.CostEstimate(
        flops=10 * n_elem,
        transcendentals=0,
        bytes_accessed=int(n_elem * (pred.dtype.itemsize + target.dtype.itemsize + 1)))
    sums, cnts = pl.pallas_call(
        masked_sum_kernel,
        out_shape=(acc_shape, acc_shape),
        grid_spec=pltpu.PrefetchScalarGridSpec(
            num_scalar_prefetch=0, grid=grid,
            in_specs=[pred_spec, targ_spec, mask_spec],
            out_specs=(out_spec, out_spec)),
        compiler_params=cparams,
        cost_estimate=cost,
    )(pred, target, mask_i8)
    # All-False mask -> 0/0 = NaN, matching torch's mean over an empty selection.
    return jnp.sum(sums) / jnp.sum(cnts)


def l1_smooth_loss(pred, target, mask=None, interpolate=True, *,
                   block_h=None, num_splits=None):
    """Matches L1SmoothLoss.forward semantics. Accepts dict with 'metric_depth'."""
    pred = extract_key(pred, KEY_OUTPUT)
    return _l1_smooth_loss_impl(pred, target, mask, interpolate=interpolate,
                                block_h=block_h, num_splits=num_splits)


# --------------------------------- reference --------------------------------- #

def _reference(pred, target, mask=None, interpolate=True):
    pred = extract_key(pred, KEY_OUTPUT)
    if pred.ndim == 3:
        pred = pred[:, None]
    if target.ndim == 3:
        target = target[:, None]
    if pred.shape[-1] != target.shape[-1] and interpolate:
        pred = _interpolate_bilinear_align_corners(pred, target.shape[-2:])
    target = jnp.broadcast_to(target, pred.shape)
    diff = pred.astype(jnp.float32) - target.astype(jnp.float32)
    elem = _smooth_l1(diff)
    if mask is None:
        return jnp.mean(elem)
    if mask.ndim == 3:
        mask = mask[:, None]
    m = jnp.broadcast_to(mask, pred.shape).astype(jnp.float32)
    return jnp.sum(elem * m) / jnp.sum(m)


if __name__ == "__main__":
    key = jax.random.PRNGKey(0)
    keys = jax.random.split(key, 7)

    N, C, H, W = 2, 4, 16, 16
    pred = jax.random.uniform(keys[0], (N, C, H, W), jnp.float32) * 10.0
    target = jax.random.uniform(keys[1], (N, H, W), jnp.float32) * 10.0
    mask = jax.random.uniform(keys[2], (N, H, W)) > 0.3
    pred_lo = jax.random.uniform(keys[3], (N, 1, H // 2, W // 2), jnp.float32) * 10.0

    # Ragged-H inputs to exercise in-kernel tail masking + forced 2-way split
    # (duplicated split steps get clamped + masked), regardless of chip.
    pred_r = jax.random.uniform(keys[4], (1, 1, 72, 16), jnp.float32) * 10.0
    target_r = jax.random.uniform(keys[5], (1, 72, 16), jnp.float32) * 10.0
    mask_r = jax.random.uniform(keys[6], (1, 72, 16)) > 0.3

    cases = [
        # (pred, target, mask, interpolate, kwargs)
        (pred, target, None, True, {}),                       # C>1, unmasked (target bcast via index_map)
        (pred, target, mask, True, {}),                       # C>1, masked
        ({KEY_OUTPUT: pred[:, :1]}, target, mask, True, {}),  # canonical C=1, dict input
        (pred_lo, target, mask, True, {}),                    # bilinear align_corners path
        (pred_r, target_r, None, True, dict(block_h=8, num_splits=2)),    # uneven split, dup-step masking
        (pred_r, target_r, mask_r, True, dict(block_h=32, num_splits=2)),  # H tail + dup-step masking, masked
    ]

    for p, t, m, interp, kw in cases:
        out = l1_smooth_loss(p, t, m, interpolate=interp, **kw)
        jax.block_until_ready(out)
        ref = _reference(p, t, m, interpolate=interp)
        assert jnp.allclose(out, ref, rtol=1e-5, atol=1e-5), (out, ref)

    print("KERNEL_OK")
</pallas_src>

<mosaic_0001>
module attributes {stable_mosaic.version = 11 : i64} {
  func.func @sum_kernel(%arg0: i32, %arg1: i32, %arg2: i32, %arg3: i32, %arg4: memref<1x1x16x16xf32, #tpu.memory_space<vmem>>, %arg5: memref<1x1x16x16xf32, #tpu.memory_space<vmem>>, %arg6: memref<1x1x1xf32, #tpu.memory_space<vmem>>) attributes {dimension_semantics = [#tpu.dimension_semantics<parallel>, #tpu.dimension_semantics<arbitrary>, #tpu.dimension_semantics<arbitrary>, #tpu.dimension_semantics<arbitrary>], iteration_bounds = array<i64: 1, 2, 4, 1>, scalar_prefetch = 0 : i64, scratch_operands = 0 : i64, tpu.core_type = #tpu.core_type<tc>, window_params = [{transform_indices = @transform_0, window_bounds = array<i64: 1, 1, 16, 16>}, {transform_indices = @transform_1, window_bounds = array<i64: 1, 1, 16, 16>}, {transform_indices = @transform_2, window_bounds = array<i64: 1, 1, 1>}]} {
    %c0_i32 = arith.constant 0 : i32
    %0 = arith.cmpi eq, %arg1, %c0_i32 : i32
    %c0_i32_0 = arith.constant 0 : i32
    %1 = arith.cmpi eq, %arg2, %c0_i32_0 : i32
    %2 = arith.andi %0, %1 : i1
    %c0_i32_1 = arith.constant 0 : i32
    %3 = arith.cmpi eq, %arg3, %c0_i32_1 : i32
    %4 = arith.andi %2, %3 : i1
    %5 = arith.extui %4 : i1 to i32
    %c0_i32_2 = arith.constant 0 : i32
    %6 = arith.cmpi ne, %5, %c0_i32_2 : i32
    scf.if %6 {
      %cst_19 = arith.constant 0.000000e+00 : f32
      %29 = vector.broadcast %cst_19 : f32 to vector<1x1x1xf32>
      %c0_20 = arith.constant 0 : index
      %c0_21 = arith.constant 0 : index
      %c0_22 = arith.constant 0 : index
      %30 = vector.load %arg6[%c0_20, %c0_21, %c0_22] : memref<1x1x1xf32, #tpu.memory_space<vmem>>, vector<1x1x1xf32>
      tpu.vector_store %arg6[%c0_20, %c0_21, %c0_22], %29 {strides = array<i32>} : memref<1x1x1xf32, #tpu.memory_space<vmem>>, vector<1x1x1xf32>,
    } else {
    }
    %c0 = arith.constant 0 : index
    %c0_3 = arith.constant 0 : index
    %c0_4 = arith.constant 0 : index
    %c0_5 = arith.constant 0 : index
    %7 = vector.load %arg4[%c0, %c0_3, %c0_4, %c0_5] : memref<1x1x16x16xf32, #tpu.memory_space<vmem>>, vector<1x1x16x16xf32>
    %8 = vector.shape_cast %7 : vector<1x1x16x16xf32> to vector<16x16xf32>
    %c0_6 = arith.constant 0 : index
    %c0_7 = arith.constant 0 : index
    %c0_8 = arith.constant 0 : index
    %c0_9 = arith.constant 0 : index
    %9 = vector.load %arg5[%c0_6, %c0_7, %c0_8, %c0_9] : memref<1x1x16x16xf32, #tpu.memory_space<vmem>>, vector<1x1x16x16xf32>
    %10 = vector.shape_cast %9 : vector<1x1x16x16xf32> to vector<16x16xf32>
    %11 = arith.subf %8, %10 : vector<16x16xf32>
    %12 = math.absf %11 : vector<16x16xf32>
    %cst = arith.constant 1.000000e+00 : f32
    %13 = vector.broadcast %cst : f32 to vector<16x16xf32>
    %14 = arith.cmpf olt, %12, %13 : vector<16x16xf32>
    %cst_10 = arith.constant 5.000000e-01 : f32
    %15 = vector.broadcast %cst_10 : f32 to vector<16x16xf32>
    %16 = arith.mulf %15, %11 : vector<16x16xf32>
    %17 = arith.mulf %16, %11 : vector<16x16xf32>
    %cst_11 = arith.constant 5.000000e-01 : f32
    %18 = vector.broadcast %cst_11 : f32 to vector<16x16xf32>
    %19 = arith.subf %12, %18 : vector<16x16xf32>
    %20 = arith.select %14, %17, %19 : vector<16x16xi1>, vector<16x16xf32>
    %c0_12 = arith.constant 0 : index
    %c0_13 = arith.constant 0 : index
    %c0_14 = arith.constant 0 : index
    %21 = vector.load %arg6[%c0_12, %c0_13, %c0_14] : memref<1x1x1xf32, #tpu.memory_space<vmem>>, vector<1x1x1xf32>
    %22 = vector.shape_cast %20 : vector<16x16xf32> to vector<1x16x16xf32>
    %cst_15 = arith.constant dense<0.000000e+00> : vector<1xf32>
    %23 = vector.multi_reduction <add>, %22, %cst_15 [1, 2] : vector<1x16x16xf32> to vector<1xf32>
    %24 = vector.shape_cast %23 : vector<1xf32> to vector<1x1x1xf32>
    %25 = vector.extract %24[0, 0, 0] : f32 from vector<1x1x1xf32>
    %26 = vector.broadcast %25 : f32 to vector<1x1x1xf32>
    %27 = arith.addf %21, %26 : vector<1x1x1xf32>
    %c0_16 = arith.constant 0 : index
    %c0_17 = arith.constant 0 : index
    %c0_18 = arith.constant 0 : index
    %28 = vector.load %arg6[%c0_16, %c0_17, %c0_18] : memref<1x1x1xf32, #tpu.memory_space<vmem>>, vector<1x1x1xf32>
    tpu.vector_store %arg6[%c0_16, %c0_17, %c0_18], %27 {strides = array<i32>} : memref<1x1x1xf32, #tpu.memory_space<vmem>>, vector<1x1x1xf32>,
    return
  }
  func.func @transform_0(%arg0: i32, %arg1: i32, %arg2: i32, %arg3: i32) -> (i32, i32, i32, i32) {
    %c1_i32 = arith.constant 1 : i32
    %0 = arith.muli %arg0, %c1_i32 : i32
    %1 = arith.addi %0, %arg3 : i32
    %c0_i32 = arith.constant 0 : i32
    %2 = arith.minsi %1, %c0_i32 : i32
    %c0_i32_0 = arith.constant 0 : i32
    %c0_i32_1 = arith.constant 0 : i32
    return %arg1, %arg2, %2, %c0_i32_0 : i32, i32, i32, i32
  }
  func.func @transform_1(%arg0: i32, %arg1: i32, %arg2: i32, %arg3: i32) -> (i32, i32, i32, i32) {
    %c1_i32 = arith.constant 1 : i32
    %0 = arith.muli %arg0, %c1_i32 : i32
    %1 = arith.addi %0, %arg3 : i32
    %c0_i32 = arith.constant 0 : i32
    %2 = arith.minsi %1, %c0_i32 : i32
    %c0_i32_0 = arith.constant 0 : i32
    %c0_i32_1 = arith.constant 0 : i32
    %c0_i32_2 = arith.constant 0 : i32
    return %arg1, %c0_i32_0, %2, %c0_i32_1 : i32, i32, i32, i32
  }
  func.func @transform_2(%arg0: i32, %arg1: i32, %arg2: i32, %arg3: i32) -> (i32, i32, i32) {
    %c0_i32 = arith.constant 0 : i32
    %c0_i32_0 = arith.constant 0 : i32
    %c0_i32_1 = arith.constant 0 : i32
    return %arg0, %c0_i32, %c0_i32_0 : i32, i32, i32
  }
}

</mosaic_0001>

<bundles_post_ra>
// kernel: _l1_smooth_loss_impl.1
= control target key start
LH: loop header
LB: loop body
LE: loop exit
PB: predicated region body
PF: predicated region fallthrough
CT: control target
= control target key end

     0   :  { %7 = vsyncpa [#allocation3], 0  ;;  %s1046_s0 = inlined_call_operand.hbm [shape: f32[2,4,16,16], index: 0, kind: input, shape index: {}]   ;;  %s1047_s1 = inlined_call_operand.hbm [shape: f32[2,1,16,16], index: 1, kind: input, shape index: {}]   ;;  %s1048_s2 = inlined_call_operand.hbm [shape: f32[1,1,1], index: 2, kind: output, shape index: {}]  }
   0x1   :  { %9 = vsyncpa [#allocation3 + $0x1], 0 }
   0x2   :  { %10 = vsyncpa [#allocation6], 0 }
   0x3   :  { %12 = vsyncpa [#allocation6 + $0x1], 0 }
   0x4   :  { %13 = vsyncpa [#allocation4], 0  ;;  %s756_s9 = smov 0   ;;  %s758_s10 = smov 0  }
   0x5   :  { %s760_s11 = smov 0   ;;  %s762_s12 = smov 0  }
   0x6   :  { %s764_s13 = smov 0   ;;  %s766_s14 = smov 0  }
   0x7   :  { %s768_s15 = smov 0   ;;  %s770_s16 = smov 0  }
   0x8   :  { %s772_s17 = smov 0   ;;  %s774_s18 = smov 0  }
   0x9   :  { %s776_s19 = smov 0  }
   0xa LB: > { %s1049_s20 = sadd.s32 4294967295, %s733_s19   ;;  %s37_s21 = sadd.s32 1, %s725_s17  ;;  %s733_s19 = sphi %s776_s19, %s19_s19   ;;  %s729_s18 = sphi %s774_s18, %s1080_s18   ;;  %s725_s17 = sphi %s772_s17, %s1079_s17   ;;  %s721_s16 = sphi %s770_s16, %s1078_s16   ;;  %s717_s15 = sphi %s768_s15, %s1077_s15   ;;  %s713_s14 = sphi %s766_s14, %s1076_s14   ;;  %s709_s13 = sphi %s764_s13, %s1075_s13   ;;  %s705_s12 = sphi %s762_s12, %s1074_s12   ;;  %s701_s11 = sphi %s760_s11, %s1073_s11   ;;  %s697_s10 = sphi %s758_s10, %s1072_s10   ;;  %s693_s9 = sphi %s756_s9, %s1071_s9  }
   0xb   : > { %p39_p0 = scmp.ge.s32.totalorder %s37_s21, 4  ;;  %s41_s22 = sadd.s32 1, %s729_s18 }
   0xc   : > { %s62_s23 = sadd.s32 1, %s713_s14  ;;  %p69_p1 = scmp.ne.s32.totalorder %s713_s14, %s709_s13 }
   0xd   : > { %s1082_s21 = smov (%p39_p0, %s37_s21), 0  ;;  %s1084_s22 = smov (!%p39_p0, %s41_s22), %s729_s18 }
   0xe   : > { %s56_s24 = ssub.s32 %s725_s17, %s1082_s21  ;;  %p1052_p2 = scmp.eq.s32.totalorder %s733_s19, 0 }
   0xf   : > { %p43_p3 = scmp.ge.s32.totalorder %s1084_s22, 2  ;;  %p75_p4 = scmp.ne.s32.totalorder %s709_s13, %s705_s12 }
  0x10   : > { %p824_p5 = por %p1052_p2, %p69_p1  ;;  %p830_p6 = scmp.eq.s32.totalorder %s1049_s20, 0 }
  0x11   : > { %s1086_s22 = smov (%p43_p3, %s1084_s22), 0  ;;  %p1051_p8 = scmp.lt.s32.totalorder %s733_s19, 8 }
  0x12   : > { %1057 = sst [smem:[#allocation11_spill]] %s1086_s22  ;;  %p838_p7 = por %p830_p6, %p75_p4 }
  0x13   : > { %s844_s28 = ssub.s32 %s729_s18, %s1086_s22  ;;  %s159_s30 = sand.u32 1, %s713_s14  }
  0x14   : > { %s1058_s27 = scalar_select %p838_p7, 1, 0 }
  0x15   : > { %s57_s29 = sor.u32 %s56_s24, %s844_s28  ;;  %s419_s3 = sshll.u32 %s159_s30, 4 }
  0x16   : > { %p60_p10 = scmp.eq.s32.totalorder %s57_s29, 0  ;;  %s420_s5 = sshll.u32 %s725_s17, 1 }
  0x17   : > { %s421_s6 = sshll.u32 %s729_s18, 3  ;;  %s163_s7 = scalar_lea.vmem [#allocation2], %s419_s3 }
  0x18   : > { %s851_s4 = scalar_select %p60_p10, %s713_s14, %s62_s23  }
  0x19   : > { %s177_s8 = sshll.u32 %s163_s7, 4  ;;  %s174_s12 = sadd.s32 %s421_s6, %s420_s5  ;;  %s855_s8 = int_to_ptr.vmem [resolvable:$true] %s177_s8 }
  0x1a   : > { %s422_s20 = sshll.u32 %s174_s12, 7  ;;  %p861_p11 = pnand %p1051_p8, %p824_p5 }
  0x1b   : > { %s868_s23 = scalar_lea.hbm %s1046_s0, %s422_s20  ;;  %s870_s3 = scalar_lea.sflag [#allocation3], %s159_s30 }
  0x1c   : > { %s549_s5 = scalar_lea.hbm %s868_s23, 256  ;;  %p551_p13 = pneg %p861_p11 }
  0x1d   : > { %p550_p12 = scmp.ne.s32.totalorder %s868_s23, %s549_s5  ;;  %s554_s7 = scalar_lea.hbm %s1046_s0, 2048 }
  0x1e   : > { %p555_p3 = scmp.lt.u32.totalorder %s868_s23, %s1046_s0  ;;  %p556_p4 = scmp.lt.u32.totalorder %s554_s7, %s549_s5 }
  0x1f   : > { %p552_p0 = pnand %p551_p13, %p550_p12  ;;  %p558_p10 = scmp.lt.u32.totalorder %s549_s5, %s868_s23 }
  0x20   : > { %p557_p5 = por %p556_p4, %p555_p3 }
  0x21   : > { %p553_p1 = pneg %p552_p0 }
  0x22   : > { %p559_p8 = por %p558_p10, %p557_p5 }
  0x24   : > { %p560_p2 = pnand %p559_p8, %p553_p1 }
  0x26   : > { %563 = shalt.err (!%p560_p2)
}
  0x27   : > { %s564_s30 = scalar_lea.vmem %s855_s8, 256  ;;  %s735_s24 = smov [#allocation2]  }
  0x28   : > { %p565_p12 = scmp.ne.s32.totalorder %s855_s8, %s564_s30  ;;  %s569_s29 = sshll.u32 %s735_s24, 4  ;;  %s570_s29 = int_to_ptr.vmem [resolvable:$false] %s569_s29 }
  0x29   : > { %s571_s25 = scalar_lea.vmem %s570_s29, 512  ;;  %p572_p7 = scmp.lt.s32.totalorder %s855_s8, %s570_s29 }
  0x2a   : > { %p567_p0 = pnand %p565_p12, %p551_p13  ;;  %p573_p3 = scmp.lt.s32.totalorder %s571_s25, %s564_s30 }
  0x2c   : > { %p568_p9 = pneg %p567_p0  ;;  %p574_p4 = por %p573_p3, %p572_p7 }
  0x2e   : > { %p575_p5 = pnand %p574_p4, %p568_p9 }
  0x30   : > { %578 = shalt.err (!%p575_p5)
}
  0x31   : > { %s736_s5 = smov 128   ;;  %s737_s6 = smov 8  }
  0x32   : > { %450 = dma.hbm_to_vmem [thread:$0]  (!%p861_p11), %s868_s23, 256, %s855_s8, %s870_s3, %s736_s5, %s736_s5, %s737_s6  }
  0x33   : > { %p426_p2 = scmp.ge.s32.totalorder %s733_s19, 1  ;;  %p211_p7 = scmp.lt.s32.totalorder %s733_s19, 9 }
  0x34   : > { %s96_s20 = sadd.s32 1, %s701_s11  ;;  %p1061_p9 = scmp.eq.s32.totalorder %s844_s28, 0 }
  0x35   : > { %p903_p8 = pnand %p426_p2, %p211_p7  ;;  %p103_p13 = scmp.ne.s32.totalorder %s701_s11, %s697_s10 }
  0x36   : > { %s911_s12 = scalar_select %p1061_p9, %s701_s11, %s96_s20  }
  0x37   : > { %p109_p1 = scmp.ne.s32.totalorder %s697_s10, %s693_s9  ;;  %s187_s30 = sand.u32 1, %s701_s11  }
  0x38   : > { %s436_s24 = sshll.u32 %s729_s18, 8  ;;  %p1062_p10 = scmp.eq.s32.totalorder %s733_s19, 0 }
  0x39   : > { %p923_p0 = por %p109_p1, %p830_p6  ;;  %s423_s8 = sshll.u32 %s187_s30, 4 }
  0x3a   : > { %p105_p12 = por %p103_p13, %p1062_p10  ;;  %s930_s29 = scalar_lea.hbm %s1047_s1, %s436_s24 }
  0x3b   : > { %s1063_s22 = scalar_select %p923_p0, 1, 0 }
  0x3c   : > { %s191_s9 = scalar_lea.vmem [#allocation5], %s423_s8  ;;  %p1064_p11 = scmp.lt.s32.totalorder %s733_s19, 8 }
  0x3d   : > { %s203_s28 = sshll.u32 %s191_s9, 4  ;;  %s940_s26 = scalar_lea.sflag [#allocation6], %s187_s30  ;;  %s938_s28 = int_to_ptr.vmem [resolvable:$true] %s203_s28 }
  0x3e   : > { %p934_p3 = pnand %p1064_p11, %p105_p12  ;;  %s579_s20 = scalar_lea.hbm %s930_s29, 256 }
  0x3f   : > { %p580_p6 = scmp.ne.s32.totalorder %s930_s29, %s579_s20  ;;  %s584_s23 = scalar_lea.hbm %s1047_s1, 512 }
  0x40   : > { %p581_p4 = pneg %p934_p3  ;;  %p585_p7 = scmp.lt.u32.totalorder %s930_s29, %s1047_s1 }
  0x41   : > { %p586_p9 = scmp.lt.u32.totalorder %s584_s23, %s579_s20  ;;  %p588_p1 = scmp.lt.u32.totalorder %s579_s20, %s930_s29 }
  0x42   : > { %p582_p5 = pnand %p581_p4, %p580_p6 }
  0x43   : > { %p587_p13 = por %p586_p9, %p585_p7 }
  0x44   : > { %p583_p2 = pneg %p582_p5 }
  0x45   : > { %p589_p10 = por %p588_p1, %p587_p13 }
  0x47   : > { %p590_p12 = pnand %p589_p10, %p583_p2 }
  0x49   : > { %593 = shalt.err (!%p590_p12)
}
  0x4a   : > { %s594_s30 = scalar_lea.vmem %s938_s28, 256  ;;  %s738_s24 = smov [#allocation5]  }
  0x4b   : > { %p595_p11 = scmp.ne.s32.totalorder %s938_s28, %s594_s30  ;;  %s599_s8 = sshll.u32 %s738_s24, 4  ;;  %s600_s8 = int_to_ptr.vmem [resolvable:$false] %s599_s8 }
  0x4c   : > { %s601_s3 = scalar_lea.vmem %s600_s8, 512  ;;  %p602_p0 = scmp.lt.s32.totalorder %s938_s28, %s600_s8 }
  0x4d   : > { %p597_p6 = pnand %p595_p11, %p581_p4  ;;  %p603_p7 = scmp.lt.s32.totalorder %s601_s3, %s594_s30 }
  0x4f   : > { %p598_p5 = pneg %p597_p6  ;;  %p604_p9 = por %p603_p7, %p602_p0 }
  0x51   : > { %p605_p13 = pnand %p604_p9, %p598_p5 }
  0x53   : > { %608 = shalt.err (!%p605_p13)
}
  0x54   : > { %453 = dma.hbm_to_vmem [thread:$0]  (!%p934_p3), %s930_s29, 256, %s938_s28, %s940_s26, %s736_s5, %s736_s5, %s737_s6  }
  0x55   : > { %215 = sbr.rel (%p903_p8) target bundleno = 343 (0x157), region = 28  ;;  %s217_s20 = sand.u32 (!%p903_p8), 1, %s709_s13  }
  0x56   : > { %s427_s23 = sshll.u32 (!%p903_p8), %s217_s20, 4  ;;  %s218_s9 = scalar_lea.sflag (!%p903_p8), [#allocation3], %s217_s20 }
  0x57   : > { %s221_s30 = scalar_lea.vmem (!%p903_p8), [#allocation2], %s427_s23  ;;  %p1066_p0 = scmp.ne.s32.totalorder (!%p903_p8), %s1058_s27, 0 }
  0x5c   : > { %680 = dma.done.wait (%p1066_p0), %s218_s9, 256  }
  0x5d   : > { %682 = vsyncadd (%p1066_p0), %s218_s9, 4294967040  ;;  %s226_s25 = sand.u32 1, %s697_s10   ;;  %p1067_p3 = scmp.ne.s32.totalorder %s1063_s22, 0 }
  0x5e   : > { %s428_s24 = sshll.u32 %s226_s25, 4  ;;  %s227_s8 = scalar_lea.sflag [#allocation6], %s226_s25 }
  0x5f   : > { %s230_s5 = scalar_lea.vmem [#allocation5], %s428_s24 }
  0x60   : > { %684 = dma.done.wait (%p1067_p3), %s227_s8, 256  }
  0x61   : > { %686 = vsyncadd (%p1067_p3), %s227_s8, 4294967040  ;;  %p259_p8 = scmp.eq.s32.totalorder %s721_s16, 0  ;;  %p260_p4 = scmp.eq.s32.totalorder %s717_s15, 0 }
  0x63   : > { %p261_p2 = pnand %p260_p4, %p259_p8 }
  0x64   : > { %vm268_vm0 = vcmask (!%p261_p2), 0   ;;  %v739_v0 = vmov (!%p261_p2), 0.0  }
  0x65   : > { %267 = sbr.rel (%p261_p2) target bundleno = 108 (0x6c), region = 40  ;;  %269 = vst.msk [vmem:[#allocation7] sm:$0x1] (!%p261_p2), %vm268_vm0, %v739_v0 }
  0x6c PF: > { %v270_v1 = vld [vmem:[%s221_s30] sm:$0xff]  ;;  %v271_v2 = vld [vmem:[%s221_s30 + $0x8] sm:$0xff]  ;;  %vm289_vm2 = vcmask 130048   ;;  %s740_s15 = smov [#allocation7]   ;;  %vm304_vm4 = vcmask 0   ;;  %s1068_s6 = sadd.s32 4294967295, %s733_s19  }
  0x6d   : > { %v272_v3 = vld [vmem:[%s230_s5] sm:$0xff]  ;;  %v273_v4 = vld [vmem:[%s230_s5 + $0x8] sm:$0xff]  ;;  %s315_s16 = sshll.u32 %s740_s15, 4  ;;  %p987_p1 = scmp.eq.s32.totalorder %s1068_s6, 7  ;;  %s316_s16 = int_to_ptr.vmem [resolvable:$true] %s315_s16 }
  0x6e   : > { %v274_v5 = vsub.f32 %v270_v1, %v272_v3  ;;  %v275_v6 = vsub.f32 %v271_v2, %v273_v4  ;;  %v288_v27 = vld [vmem:[#allocation7] sm:$0x1]  ;;  %s609_s22 = scalar_lea.vmem %s316_s16, 16  ;;  %s615_s29 = scalar_lea.vmem %s316_s16, 32 }
  0x6f   : > { %p610_p10 = scmp.ne.s32.totalorder %s316_s16, %s609_s22  ;;  %p616_p6 = scmp.lt.s32.totalorder %s316_s16, %s316_s16 }
  0x70   : > { %v276_v7 = vand.u32 2147483647, %v274_v5  ;;  %v280_v8 = vmul.f32 0.5, %v274_v5  ;;  %v277_v9 = vand.u32 2147483647, %v275_v6  ;;  %v281_v10 = vmul.f32 0.5, %v275_v6  ;;  %p617_p5 = scmp.lt.s32.totalorder %s615_s29, %s609_s22 }
  0x71   : > { %p611_p12 = pnand %p610_p10, %p987_p1 }
  0x72   : > { %vm278_vm1 = vcmp.lt.f32.partialorder %v276_v7, 1.0  ;;  %v282_v11 = vmul.f32 %v280_v8, %v274_v5  ;;  %v430_v12 = vadd.f32 -0.5, %v276_v7  ;;  %vm279_vm3 = vcmp.lt.f32.partialorder %v277_v9, 1.0  ;;  %p618_p7 = por %p617_p5, %p616_p6 }
  0x73   : > { %v283_v13 = vmul.f32 %v281_v10, %v275_v6  ;;  %v431_v14 = vadd.f32 -0.5, %v277_v9  ;;  %p612_p11 = pneg %p611_p12 }
  0x74   : > { %v286_v15 = vsel %vm278_vm1, %v282_v11, %v430_v12 }
  0x75   : > { %v287_v16 = vsel %vm279_vm3, %v283_v13, %v431_v14  ;;  %v290_v17 = vsel %vm289_vm2, %v286_v15, 0.0  ;;  %p619_p9 = pnand %p618_p7, %p612_p11 }
  0x76   : > { %v291_v18 = vsel %vm289_vm2, %v287_v16, 0.0 }
  0x77   : > { %v292_v19 = vadd.f32 %v291_v18, %v290_v17 }
  0x79   : > { %293 = vadd.xlane.f32.xlu0 %v292_v19 }
 0x106   : > { %v294_v20 = vpop.xlane.xlu0 %293 }
 0x107   : > { %v295_v21 = vrot.slane %v294_v20, 4 }
 0x109   : > { %v296_v22 = vadd.f32 %v295_v21, %v294_v20 }
 0x10b   : > { %v297_v23 = vrot.slane %v296_v22, 2 }
 0x10d   : > { %v298_v24 = vadd.f32 %v297_v23, %v296_v22 }
 0x10f   : > { %v299_v25 = vrot.slane %v298_v24, 1 }
 0x111   : > { %v300_v26 = vadd.f32 %v299_v25, %v298_v24 }
 0x113   : > { %437 = vpush %v300_v26 }
 0x144   : > { %s438_s27 = spop %437 }
 0x145   : > { %v302_v28 = vstv %s438_s27 }
 0x146   : > { %v303_v29 = vadd.f32 %v302_v28, %v288_v27 }
 0x148   : > { %305 = vst.msk [vmem:[#allocation7] sm:$0x1] %vm304_vm4, %v303_v29 }
 0x149   : > { %622 = shalt.err (!%p619_p9)
}
 0x14a   : > { %s623_s3 = scalar_lea.hbm %s1048_s2, 16 }
 0x14b   : > { %p624_p13 = scmp.ne.s32.totalorder %s1048_s2, %s623_s3  ;;  %p629_p8 = scmp.lt.u32.totalorder %s623_s3, %s1048_s2 }
 0x14d   : > { %p625_p0 = pnand %p624_p13, %p987_p1 }
 0x14f   : > { %p626_p3 = pneg %p625_p0 }
 0x151   : > { %p631_p4 = pnand %p629_p8, %p626_p3 }
 0x153   : > { %634 = shalt.err (!%p631_p4)
}
 0x154   : > { %444 = dma.vmem_to_hbm [thread:$0]  (%p987_p1), %s316_s16, 16, %s1048_s2, [#allocation4]  }
 0x155   : > { %688 = dma.done.wait (%p987_p1), [#allocation4], 16  }
 0x156   : > { %690 = vsyncadd (%p987_p1), [#allocation4], 4294967280 }
 0x157 PF: > { %s19_s19 = sadd.s32 1, %s733_s19   ;;  %s1070_s8 = sld [smem:[#allocation11_spill]] }
 0x158   : > { %p16_p2 = scmp.ge.s32.totalorder %s19_s19, 10   ;;  %s1071_s9 = smov %s697_s10 }
 0x159   : > { %s1072_s10 = smov %s701_s11  ;;  %s1073_s11 = smov %s911_s12 }
 0x15a   : > { %s1074_s12 = smov %s709_s13  ;;  %s1075_s13 = smov %s713_s14 }
 0x15b   : > { %s1076_s14 = smov %s851_s4  ;;  %s1077_s15 = smov %s725_s17 }
 0x15c   : > { %s1078_s16 = smov %s729_s18  ;;  %s1079_s17 = smov %s1082_s21 }
 0x15d   : > { %s1080_s18 = smov %s1070_s8  ;;  %18 = sbr.rel (!%p16_p2) target bundleno = 10 (0xa), region = 83 }
 0x164   :  { %328 = vsyncpa [#allocation3], 1 }
 0x165   :  { %330 = vsyncpa [#allocation3 + $0x1], 1 }
 0x166   :  { %331 = vsyncpa [#allocation6], 1 }
 0x167   :  { %333 = vsyncpa [#allocation6 + $0x1], 1 }
 0x168   :  { %334 = vsyncpa [#allocation4], 1 }
 0x169   :  { %336 = vsyncpa [#allocation4 + $0x1], 1 }

</bundles_post_ra>
